<compile_context>
chip_gen: v7x
topology: tpu7x:2x2x1
jax: 0.10.0
libtpu: 0.0.40
codegen_flags: <defaults>
</compile_context>

<pallas_src>
import functools

import numpy as np
import jax
import jax.numpy as jnp
from jax.experimental import pallas as pl
from jax.experimental.pallas import tpu as pltpu


def _round_up(x: int, m: int) -> int:
    return ((x + m - 1) // m) * m


@functools.lru_cache(maxsize=None)
def _bilinear_weight_matrix_np(out_size: int, in_size: int) -> np.ndarray:
    """(out_size, in_size) bilinear interpolation matrix (host numpy, cached).

    Matches torch F.interpolate(mode='bilinear', align_corners=False,
    antialias=False): src = (dst + 0.5) * scale - 0.5, clamped at 0,
    neighbor clamped to in_size - 1.  Rows are non-negative and sum to 1.
    """
    if out_size == in_size:
        return np.eye(out_size, dtype=np.float32)
    scale = in_size / out_size
    dst = np.arange(out_size, dtype=np.float64)
    src = np.maximum((dst + 0.5) * scale - 0.5, 0.0)
    i0 = np.minimum(np.floor(src).astype(np.int64), in_size - 1)
    i1 = np.minimum(i0 + 1, in_size - 1)
    frac = (src - i0).astype(np.float32)
    w = np.zeros((out_size, in_size), dtype=np.float32)
    rows = np.arange(out_size)
    np.add.at(w, (rows, i0), 1.0 - frac)
    np.add.at(w, (rows, i1), frac)
    return w


@functools.lru_cache(maxsize=None)
def _padded_weights(out_h, out_w, h_in, w_in, h_out_pad, w_out_pad, compute_dtype):
    """Device weight matrices, zero-padded to the lane/sublane-dense kernel shapes."""
    wh = _bilinear_weight_matrix_np(out_h, h_in)            # (out_h, h_in)
    ww = _bilinear_weight_matrix_np(out_w, w_in)            # (out_w, w_in)
    wh_p = np.zeros((h_out_pad, h_in), np.float32)
    wh_p[:out_h] = wh
    ww_p = np.zeros((w_in, w_out_pad), np.float32)
    ww_p[:, :out_w] = ww.T
    return (jnp.asarray(wh_p, dtype=compute_dtype),
            jnp.asarray(ww_p, dtype=compute_dtype))


@functools.lru_cache(maxsize=None)
def _get_resize_fn(c, h_in, w_in, h_out_pad, w_out_pad,
                   in_dtype, compute_dtype, out_is_int, h_first):
    """Build (and cache) a jitted pallas_call for one padded shape signature."""

    def kernel(x_ref, wh_ref, ww_ref, o_ref):
        # x_ref : (c, h_in, w_in)           image (all channels, one grid step)
        # wh_ref: (h_out_pad, h_in)         row-interpolation matrix (zero-padded rows)
        # ww_ref: (w_in, w_out_pad)         col-interpolation matrix^T (zero-padded cols)
        # o_ref : (c, h_out_pad, w_out_pad) lane-dense padded output
        wh = wh_ref[...]
        ww = ww_ref[...]
        x = x_ref[...].astype(compute_dtype)

        if h_first:
            # per-channel row resize, then ONE flattened column resize (M = c*h_out_pad)
            rows = [jnp.dot(wh, x[ch], preferred_element_type=jnp.float32)
                    for ch in range(c)]
            tmp = jnp.concatenate(rows, axis=0).astype(compute_dtype)  # (c*h_out_pad, w_in)
            y = jnp.dot(tmp, ww, preferred_element_type=jnp.float32)   # (c*h_out_pad, w_out_pad)
            for ch in range(c):
                out_c = y[ch * h_out_pad:(ch + 1) * h_out_pad]
                if out_is_int:
                    out_c = jnp.round(out_c)
                o_ref[ch] = out_c.astype(o_ref.dtype)
        else:
            # ONE flattened column resize (M = c*h_in), then per-channel row resize
            xf = x.reshape(c * h_in, w_in)
            y = jnp.dot(xf, ww, preferred_element_type=jnp.float32)    # (c*h_in, w_out_pad)
            y = y.astype(compute_dtype)
            for ch in range(c):
                out_c = jnp.dot(wh, y[ch * h_in:(ch + 1) * h_in],
                                preferred_element_type=jnp.float32)
                if out_is_int:
                    out_c = jnp.round(out_c)
                o_ref[ch] = out_c.astype(o_ref.dtype)

    in_isize = np.dtype(in_dtype).itemsize
    c_isize = jnp.finfo(compute_dtype).bits // 8
    bytes_needed = (c * h_in * w_in * in_isize
                    + h_out_pad * h_in * c_isize
                    + w_in * w_out_pad * c_isize
                    + c * h_out_pad * w_out_pad * in_isize
                    + c * max(h_in, h_out_pad) * max(w_in, w_out_pad) * 4)
    # >= 32 MiB (above v5e's 16 MiB default scoped limit), capped at v7x physical 64 MiB.
    vmem_limit = int(min(64 * 1024 * 1024,
                         max(32 * 1024 * 1024, 3 * bytes_needed + (4 << 20))))

    call = pl.pallas_call(
        kernel,
        out_shape=jax.ShapeDtypeStruct((c, h_out_pad, w_out_pad), in_dtype),
        grid=(1,),
        in_specs=[
            pl.BlockSpec((c, h_in, w_in), lambda i: (0, 0, 0)),
            pl.BlockSpec((h_out_pad, h_in), lambda i: (0, 0)),
            pl.BlockSpec((w_in, w_out_pad), lambda i: (0, 0)),
        ],
        out_specs=pl.BlockSpec((c, h_out_pad, w_out_pad), lambda i: (0, 0, 0)),
        compiler_params=pltpu.CompilerParams(
            dimension_semantics=("arbitrary",),
            vmem_limit_bytes=vmem_limit),
    )
    return jax.jit(call)


def pallas_bilinear_resize(img: jnp.ndarray, out_h: int, out_w: int) -> jnp.ndarray:
    """Bilinear resize of one image (C, H_in, W_in) -> (C, out_h, out_w)."""
    c, h_in, w_in = img.shape
    out_h, out_w = int(out_h), int(out_w)

    # identity short-circuit: no MXU work needed
    if out_h == h_in and out_w == w_in:
        return jnp.asarray(img)

    in_dtype = np.dtype(img.dtype)
    compute_dtype = jnp.bfloat16 if img.dtype == jnp.bfloat16 else jnp.float32
    out_is_int = bool(jnp.issubdtype(img.dtype, jnp.integer))

    # lane/sublane-dense padded output shape (sliced back below)
    h_out_pad = _round_up(out_h, 8)
    w_out_pad = _round_up(out_w, 128)

    # pick matmul order minimizing MXU FLOPs (per channel)
    h_first_cost = h_out_pad * w_in * (h_in + w_out_pad)
    w_first_cost = h_in * w_out_pad * (w_in + h_out_pad)
    h_first = bool(h_first_cost <= w_first_cost)

    wh, ww = _padded_weights(out_h, out_w, h_in, w_in,
                             h_out_pad, w_out_pad, compute_dtype)
    fn = _get_resize_fn(c, h_in, w_in, h_out_pad, w_out_pad,
                        in_dtype, compute_dtype, out_is_int, h_first)
    out = fn(img, wh, ww)
    return out[:, :out_h, :out_w]


class ResizePostProcessor:
    """JAX/Pallas port of kornia ResizePostProcessor.

    Resizes each image in the batch back to its per-image original
    (height, width) and returns a list of (1, C, H_i, W_i) arrays,
    mirroring the PyTorch forward.
    """

    def __init__(self, interpolation_mode: str = "bilinear") -> None:
        if interpolation_mode != "bilinear":
            # TODO(synk): only 'bilinear' interpolation is implemented in the Pallas kernel.
            raise NotImplementedError(interpolation_mode)
        self.interpolation_mode = interpolation_mode

    def __call__(self, imgs, original_sizes):
        # imgs: (B, C, H, W) array or list of (C, H, W) arrays
        # original_sizes: (B, 2) integer array of (height, width) — read on host,
        # mirroring the PyTorch `.cpu().long().numpy().tolist()` behavior.
        iters = len(imgs) if isinstance(imgs, list) else imgs.shape[0]
        sizes = np.asarray(original_sizes).astype(np.int64)
        resized = []
        for i in range(iters):
            img = imgs[i]
            out_h, out_w = int(sizes[i, 0]), int(sizes[i, 1])
            resized.append(pallas_bilinear_resize(img, out_h, out_w)[None])
        return resized


if __name__ == "__main__":
    key = jax.random.PRNGKey(0)
    B, C, H, W = 2, 4, 16, 16
    imgs = jax.random.normal(key, (B, C, H, W), dtype=jnp.float32)
    original_sizes = jnp.array([[20, 24], [12, 16]], dtype=jnp.int32)

    post = ResizePostProcessor("bilinear")
    outs = post(imgs, original_sizes)
    outs = [jax.block_until_ready(o) for o in outs]

    # pure-JAX reference (separable bilinear weights) to validate the kernel
    ok = True
    sizes_np = np.asarray(original_sizes)
    for i, o in enumerate(outs):
        h_i, w_i = int(sizes_np[i, 0]), int(sizes_np[i, 1])
        if o.shape != (1, C, h_i, w_i):
            ok = False
            continue
        wh = jnp.asarray(_bilinear_weight_matrix_np(h_i, H))
        ww = jnp.asarray(_bilinear_weight_matrix_np(w_i, W))
        ref = jnp.einsum("oh,chw,pw->cop", wh, imgs[i], ww)
        ok = ok and bool(jnp.allclose(o[0], ref, atol=1e-5, rtol=1e-5))

    # extra check: exercises the W-first matmul-order branch (H upscale, W downscale)
    big = jax.block_until_ready(pallas_bilinear_resize(imgs[0], 160, 8))
    wh = jnp.asarray(_bilinear_weight_matrix_np(160, H))
    ww = jnp.asarray(_bilinear_weight_matrix_np(8, W))
    ref = jnp.einsum("oh,chw,pw->cop", wh, imgs[0], ww)
    ok = ok and (big.shape == (C, 160, 8))
    ok = ok and bool(jnp.allclose(big, ref, atol=1e-5, rtol=1e-5))

    # identity short-circuit check
    same = jax.block_until_ready(pallas_bilinear_resize(imgs[1], H, W))
    ok = ok and bool(jnp.allclose(same, imgs[1]))

    print("KERNEL_OK" if ok else "MISMATCH")
</pallas_src>

<mosaic_0001>
module attributes {stable_mosaic.version = 11 : i64} {
  func.func @kernel(%arg0: i32, %arg1: memref<4x16x16xf32, #tpu.memory_space<vmem>>, %arg2: memref<24x16xf32, #tpu.memory_space<vmem>>, %arg3: memref<16x128xf32, #tpu.memory_space<vmem>>, %arg4: memref<4x24x128xf32, #tpu.memory_space<vmem>>) attributes {dimension_semantics = [#tpu.dimension_semantics<arbitrary>], iteration_bounds = array<i64: 1>, scalar_prefetch = 0 : i64, scratch_operands = 0 : i64, tpu.core_type = #tpu.core_type<tc>, window_params = [{pipeline_mode = #tpu.pipeline_mode<synchronous>, transform_indices = @transform_0, window_bounds = array<i64: 4, 16, 16>}, {pipeline_mode = #tpu.pipeline_mode<synchronous>, transform_indices = @transform_1, window_bounds = array<i64: 24, 16>}, {pipeline_mode = #tpu.pipeline_mode<synchronous>, transform_indices = @transform_2, window_bounds = array<i64: 16, 128>}, {pipeline_mode = #tpu.pipeline_mode<synchronous>, transform_indices = @transform_3, window_bounds = array<i64: 4, 24, 128>}]} {
    %c0 = arith.constant 0 : index
    %c0_0 = arith.constant 0 : index
    %0 = vector.load %arg2[%c0, %c0_0] : memref<24x16xf32, #tpu.memory_space<vmem>>, vector<24x16xf32>
    %c0_1 = arith.constant 0 : index
    %c0_2 = arith.constant 0 : index
    %1 = vector.load %arg3[%c0_1, %c0_2] : memref<16x128xf32, #tpu.memory_space<vmem>>, vector<16x128xf32>
    %c0_3 = arith.constant 0 : index
    %c0_4 = arith.constant 0 : index
    %c0_5 = arith.constant 0 : index
    %2 = vector.load %arg1[%c0_3, %c0_4, %c0_5] : memref<4x16x16xf32, #tpu.memory_space<vmem>>, vector<4x16x16xf32>
    %3 = vector.extract_strided_slice %2 {offsets = [0, 0, 0], sizes = [1, 16, 16], strides = [1, 1, 1]} : vector<4x16x16xf32> to vector<1x16x16xf32>
    %4 = vector.shape_cast %3 : vector<1x16x16xf32> to vector<16x16xf32>
    %cst = arith.constant dense<0.000000e+00> : vector<24x16xf32>
    %5 = tpu.matmul %0, %4, %cst {dimension_numbers = #tpu.dot_dimension_numbers<[1], [0], [0], [1], [0, 0, 1, 1], [], []>} : vector<24x16xf32>, vector<16x16xf32>, vector<24x16xf32> -> vector<24x16xf32>
    %6 = vector.extract_strided_slice %2 {offsets = [1, 0, 0], sizes = [1, 16, 16], strides = [1, 1, 1]} : vector<4x16x16xf32> to vector<1x16x16xf32>
    %7 = vector.shape_cast %6 : vector<1x16x16xf32> to vector<16x16xf32>
    %cst_6 = arith.constant dense<0.000000e+00> : vector<24x16xf32>
    %8 = tpu.matmul %0, %7, %cst_6 {dimension_numbers = #tpu.dot_dimension_numbers<[1], [0], [0], [1], [0, 0, 1, 1], [], []>} : vector<24x16xf32>, vector<16x16xf32>, vector<24x16xf32> -> vector<24x16xf32>
    %9 = vector.extract_strided_slice %2 {offsets = [2, 0, 0], sizes = [1, 16, 16], strides = [1, 1, 1]} : vector<4x16x16xf32> to vector<1x16x16xf32>
    %10 = vector.shape_cast %9 : vector<1x16x16xf32> to vector<16x16xf32>
    %cst_7 = arith.constant dense<0.000000e+00> : vector<24x16xf32>
    %11 = tpu.matmul %0, %10, %cst_7 {dimension_numbers = #tpu.dot_dimension_numbers<[1], [0], [0], [1], [0, 0, 1, 1], [], []>} : vector<24x16xf32>, vector<16x16xf32>, vector<24x16xf32> -> vector<24x16xf32>
    %12 = vector.extract_strided_slice %2 {offsets = [3, 0, 0], sizes = [1, 16, 16], strides = [1, 1, 1]} : vector<4x16x16xf32> to vector<1x16x16xf32>
    %13 = vector.shape_cast %12 : vector<1x16x16xf32> to vector<16x16xf32>
    %cst_8 = arith.constant dense<0.000000e+00> : vector<24x16xf32>
    %14 = tpu.matmul %0, %13, %cst_8 {dimension_numbers = #tpu.dot_dimension_numbers<[1], [0], [0], [1], [0, 0, 1, 1], [], []>} : vector<24x16xf32>, vector<16x16xf32>, vector<24x16xf32> -> vector<24x16xf32>
    %15 = tpu.concatenate %5, %8, %11, %14 in 0 : vector<24x16xf32>, vector<24x16xf32>, vector<24x16xf32>, vector<24x16xf32> -> vector<96x16xf32>
    %cst_9 = arith.constant dense<0.000000e+00> : vector<96x128xf32>
    %16 = tpu.matmul %15, %1, %cst_9 {dimension_numbers = #tpu.dot_dimension_numbers<[1], [0], [0], [1], [0, 0, 1, 1], [], []>} : vector<96x16xf32>, vector<16x128xf32>, vector<96x128xf32> -> vector<96x128xf32>
    %17 = vector.extract_strided_slice %16 {offsets = [0, 0], sizes = [24, 128], strides = [1, 1]} : vector<96x128xf32> to vector<24x128xf32>
    %c0_10 = arith.constant 0 : index
    %c0_11 = arith.constant 0 : index
    %c0_12 = arith.constant 0 : index
    %18 = vector.load %arg4[%c0_10, %c0_11, %c0_12] : memref<4x24x128xf32, #tpu.memory_space<vmem>>, vector<1x24x128xf32>
    %19 = vector.shape_cast %18 : vector<1x24x128xf32> to vector<24x128xf32>
    %20 = vector.shape_cast %17 : vector<24x128xf32> to vector<1x24x128xf32>
    tpu.vector_store %arg4[%c0_10, %c0_11, %c0_12], %20 {strides = array<i32>} : memref<4x24x128xf32, #tpu.memory_space<vmem>>, vector<1x24x128xf32>,
    %21 = vector.extract_strided_slice %16 {offsets = [24, 0], sizes = [24, 128], strides = [1, 1]} : vector<96x128xf32> to vector<24x128xf32>
    %c1 = arith.constant 1 : index
    %c0_13 = arith.constant 0 : index
    %c0_14 = arith.constant 0 : index
    %22 = vector.load %arg4[%c1, %c0_13, %c0_14] : memref<4x24x128xf32, #tpu.memory_space<vmem>>, vector<1x24x128xf32>
    %23 = vector.shape_cast %22 : vector<1x24x128xf32> to vector<24x128xf32>
    %24 = vector.shape_cast %21 : vector<24x128xf32> to vector<1x24x128xf32>
    tpu.vector_store %arg4[%c1, %c0_13, %c0_14], %24 {strides = array<i32>} : memref<4x24x128xf32, #tpu.memory_space<vmem>>, vector<1x24x128xf32>,
    %25 = vector.extract_strided_slice %16 {offsets = [48, 0], sizes = [24, 128], strides = [1, 1]} : vector<96x128xf32> to vector<24x128xf32>
    %c2 = arith.constant 2 : index
    %c0_15 = arith.constant 0 : index
    %c0_16 = arith.constant 0 : index
    %26 = vector.load %arg4[%c2, %c0_15, %c0_16] : memref<4x24x128xf32, #tpu.memory_space<vmem>>, vector<1x24x128xf32>
    %27 = vector.shape_cast %26 : vector<1x24x128xf32> to vector<24x128xf32>
    %28 = vector.shape_cast %25 : vector<24x128xf32> to vector<1x24x128xf32>
    tpu.vector_store %arg4[%c2, %c0_15, %c0_16], %28 {strides = array<i32>} : memref<4x24x128xf32, #tpu.memory_space<vmem>>, vector<1x24x128xf32>,
    %29 = vector.extract_strided_slice %16 {offsets = [72, 0], sizes = [24, 128], strides = [1, 1]} : vector<96x128xf32> to vector<24x128xf32>
    %c3 = arith.constant 3 : index
    %c0_17 = arith.constant 0 : index
    %c0_18 = arith.constant 0 : index
    %30 = vector.load %arg4[%c3, %c0_17, %c0_18] : memref<4x24x128xf32, #tpu.memory_space<vmem>>, vector<1x24x128xf32>
    %31 = vector.shape_cast %30 : vector<1x24x128xf32> to vector<24x128xf32>
    %32 = vector.shape_cast %29 : vector<24x128xf32> to vector<1x24x128xf32>
    tpu.vector_store %arg4[%c3, %c0_17, %c0_18], %32 {strides = array<i32>} : memref<4x24x128xf32, #tpu.memory_space<vmem>>, vector<1x24x128xf32>,
    return
  }
  func.func @transform_0(%arg0: i32) -> (i32, i32, i32) {
    %c0_i32 = arith.constant 0 : i32
    %c0_i32_0 = arith.constant 0 : i32
    %c0_i32_1 = arith.constant 0 : i32
    %c0_i32_2 = arith.constant 0 : i32
    return %c0_i32, %c0_i32_0, %c0_i32_1 : i32, i32, i32
  }
  func.func @transform_1(%arg0: i32) -> (i32, i32) {
    %c0_i32 = arith.constant 0 : i32
    %c0_i32_0 = arith.constant 0 : i32
    %c0_i32_1 = arith.constant 0 : i32
    return %c0_i32, %c0_i32_0 : i32, i32
  }
  func.func @transform_2(%arg0: i32) -> (i32, i32) {
    %c0_i32 = arith.constant 0 : i32
    %c0_i32_0 = arith.constant 0 : i32
    %c0_i32_1 = arith.constant 0 : i32
    return %c0_i32, %c0_i32_0 : i32, i32
  }
  func.func @transform_3(%arg0: i32) -> (i32, i32, i32) {
    %c0_i32 = arith.constant 0 : i32
    %c0_i32_0 = arith.constant 0 : i32
    %c0_i32_1 = arith.constant 0 : i32
    %c0_i32_2 = arith.constant 0 : i32
    return %c0_i32, %c0_i32_0, %c0_i32_1 : i32, i32, i32
  }
}

</mosaic_0001>

<bundles_post_ra>
// kernel: tpu_custom_call.1
= control target key start
LH: loop header
LB: loop body
LE: loop exit
PB: predicated region body
PF: predicated region fallthrough
CT: control target
= control target key end

     0   :  { %8 = vsyncpa [#allocation3], 0  ;;  %s876_s0 = inlined_call_operand.hbm [shape: f32[4,16,16], index: 0, kind: input, shape index: {}]   ;;  %s877_s1 = inlined_call_operand.vmem [shape: f32[24,16], index: 1, kind: input, shape index: {}]   ;;  %s878_s2 = inlined_call_operand.vmem [shape: f32[16,128], index: 2, kind: input, shape index: {}]   ;;  %s879_s3 = inlined_call_operand.hbm [shape: f32[4,24,128], index: 3, kind: output, shape index: {}]  }
   0x1   :  { %9 = vsyncpa [#allocation4], 0  ;;  %s768_s12 = smov [#allocation2]   ;;  %s720_s16 = scalar_lea.hbm %s876_s0, 1024 }
   0x2   :  { %s15_s13 = sshll.u32 %s768_s12, 4  ;;  %p721_p0 = scmp.ne.s32.totalorder %s876_s0, %s720_s16  ;;  %s16_s13 = int_to_ptr.vmem [resolvable:$true] %s15_s13 }
   0x3   :  { %p724_p1 = scmp.lt.u32.totalorder %s720_s16, %s876_s0 }
   0x5   :  { %p726_p2 = pnand %p724_p1, %p721_p0 }
   0x7   :  { %729 = shalt.err (!%p726_p2)
}
   0x8   :  { %s730_s21 = scalar_lea.vmem %s16_s13, 1024  ;;  %p735_p4 = scmp.lt.s32.totalorder %s16_s13, %s16_s13 }
   0x9   :  { %p731_p3 = scmp.ne.s32.totalorder %s16_s13, %s730_s21  ;;  %p736_p5 = scmp.lt.s32.totalorder %s730_s21, %s730_s21 }
   0xb   :  { %p737_p6 = por %p736_p5, %p735_p4 }
   0xd   :  { %p738_p7 = pnand %p737_p6, %p731_p3 }
   0xf   :  { %741 = shalt.err (!%p738_p7)
}
  0x10   :  { %s769_s22 = smov 128   ;;  %s770_s23 = smov 8  }
  0x11   :  { %21 = dma.hbm_to_vmem [thread:$0]  %s876_s0, 1024, %s16_s13, [#allocation3], %s769_s22, %s769_s22, %s770_s23  }
  0x12   :  { %764 = dma.done.wait [#allocation3], 1024  }
  0x13   :  { %765 = vsyncadd [#allocation3], 4294966272  ;;  %v771_v0 = vmov 0.0|0.0   ;;  %vm772_vm0 = vmmov 0   ;;  %v773_v1 = vmov 0.0   ;;  %v34_v2 = vld [vmem:[#allocation2] sm:$0xff] }
  0x14   :  { %697 = vmatprep.subr.bf16.mxu1 %v771_v0  ;;  %627 = vmatprep.mubr.msk.f32.mxu1 %vm772_vm0, %v773_v1  ;;  %v35_v3 = vld [vmem:[#allocation2 + $0x8] sm:$0xff]  ;;  %v36_v5 = vld [vmem:[#allocation2 + $0x10] sm:$0xff]  ;;  %v37_v6 = vld [vmem:[#allocation2 + $0x18] sm:$0xff]  ;;  %vm42_vm1 = vcmask 130048  }
  0x15   :  { %703 = vmatprep.subr.bf16.mxu0 %v771_v0  ;;  %653 = vmatprep.mubr.msk.f32.mxu0 %vm772_vm0, %v773_v1  ;;  %v698_v4 = vpack.c.bf16 %v35_v3, %v34_v2  ;;  %v29_v7 = vld [vmem:[%s877_s1] sm:$0xff]  ;;  %v701_v8 = vpack.c.bf16 %v37_v6, %v36_v5  ;;  %v39_v10 = vld [vmem:[#allocation2 + $0x28] sm:$0xff]  ;;  %v31_v13 = vld [vmem:[%s877_s1 + $0x10] sm:$0xff] }
  0x16   :  { %v38_v9 = vld [vmem:[#allocation2 + $0x20] sm:$0xff]  ;;  %v30_v12 = vld [vmem:[%s877_s1 + $0x8] sm:$0xff]  ;;  %v40_v14 = vld [vmem:[#allocation2 + $0x30] sm:$0xff] }
  0x17   :  { %699 = vmatpush3.bf16.msra.mxu1 %v698_v4  ;;  %v704_v11 = vpack.c.bf16 %v39_v10, %v38_v9  ;;  %v41_v15 = vld [vmem:[#allocation2 + $0x38] sm:$0xff]  ;;  %v32_v17 = vld [vmem:[%s878_s2] sm:$0xff]  ;;  %v33_v18 = vld [vmem:[%s878_s2 + $0x8] sm:$0xff]  ;;  %s774_s2 = smov [#allocation5]  }
  0x18   :  { %700 = vmatprep.subr.bf16.mxu1 %v771_v0  ;;  %v707_v16 = vpack.c.bf16 %v41_v15, %v40_v14  ;;  %v709_v19 = vpack.c.bf16 %v33_v18, %v32_v17  ;;  %s553_s7 = sshll.u32 %s774_s2, 4  ;;  %s554_s7 = int_to_ptr.vmem [resolvable:$true] %s553_s7 }
  0x19   :  { %705 = vmatpush3.bf16.msra.mxu0 %v704_v11  ;;  %s742_s8 = scalar_lea.vmem %s554_s7, 1536  ;;  %p747_p9 = scmp.lt.s32.totalorder %s554_s7, %s554_s7 }
  0x1a   :  { %628 = vmatmul.mubr.msk.f32.vlgmr.msra.gmra.mrb[0].mxu1 %vm42_vm1, %v29_v7  ;;  %710 = vmatprep.subr.bf16.mxu0 %v709_v19  ;;  %p743_p8 = scmp.ne.s32.totalorder %s554_s7, %s742_s8  ;;  %p748_p10 = scmp.lt.s32.totalorder %s742_s8, %s742_s8 }
  0x1b   :  { %702 = vmatpush3.bf16.msra.mxu1 %v701_v8  ;;  %630 = vmatprep.mubr.msk.f32.mxu1 %vm772_vm0, %v773_v1 }
  0x1c   :  { %706 = vmatprep.subr.bf16.mxu1 %v771_v0  ;;  %654 = vmatmul.mubr.msk.f32.vlgmr.msra.gmra.mrb[0].mxu0 %vm42_vm1, %v29_v7  ;;  %p749_p11 = por %p748_p10, %p747_p9 }
  0x1d   :  { %656 = vmatprep.mubr.msk.f32.mxu0 %vm772_vm0, %v773_v1  ;;  %712 = vmatpush3.bf16.msra.mxu0 %v709_v19 }
  0x1e   :  { %631 = vmatmul.mubr.msk.f32.gmra.mrb[2].mxu1 %vm42_vm1, %v30_v12  ;;  %p750_p12 = pnand %p749_p11, %p743_p8 }
  0x1f   :  { %633 = vmatprep.mubr.msk.f32.mxu1 %vm772_vm0, %v773_v1 }
  0x20   :  { %657 = vmatmul.mubr.msk.f32.gmra.mrb[2].mxu0 %vm42_vm1, %v30_v12 }
  0x21   :  { %659 = vmatprep.mubr.msk.f32.mxu0 %vm772_vm0, %v773_v1 }
  0x22   :  { %634 = vmatmul.mubr.msk.f32.gmra.mrb[4].mxu1 %vm42_vm1, %v31_v13 }
  0x23   :  { %640 = vmatprep.mubr.msk.f32.mxu1 %vm772_vm0, %v773_v1 }
  0x24   :  { %660 = vmatmul.mubr.msk.f32.gmra.mrb[4].mxu0 %vm42_vm1, %v31_v13 }
  0x26   :  { %641 = vmatmul.mubr.msk.f32.vlgmr.msra.gmra.mrb[6].mxu1 %vm42_vm1, %v29_v7 }
  0x27   :  { %708 = vmatpush3.bf16.msra.mxu1 %v707_v16  ;;  %643 = vmatprep.mubr.msk.f32.mxu1 %vm772_vm0, %v773_v1 }
  0x2a   :  { %644 = vmatmul.mubr.msk.f32.gmra.mrb[8].mxu1 %vm42_vm1, %v30_v12 }
  0x2b   :  { %646 = vmatprep.mubr.msk.f32.mxu1 %vm772_vm0, %v773_v1 }
  0x2e   :  { %647 = vmatmul.mubr.msk.f32.gmra.mrb[10].mxu1 %vm42_vm1, %v31_v13 }
  0x2f   :  { %666 = vmatprep.mubr.msk.f32.mxu1 %vm772_vm0, %v773_v1 }
  0x32   :  { %667 = vmatmul.mubr.msk.f32.vlgmr.msra.gmra.mrb[12].mxu1 %vm42_vm1, %v29_v7 }
  0x33   :  { %669 = vmatprep.mubr.msk.f32.mxu1 %vm772_vm0, %v773_v1 }
  0x36   :  { %670 = vmatmul.mubr.msk.f32.gmra.mrb[14].mxu1 %vm42_vm1, %v30_v12 }
  0x37   :  { %672 = vmatprep.mubr.msk.f32.mxu1 %vm772_vm0, %v773_v1 }
  0x3a   :  { %673 = vmatmul.mubr.msk.f32.gmra.mrb[16].mxu1 %vm42_vm1, %v31_v13 }
  0xed   :  { %v118_v20 = vpop.f32.mrb[0].mxu1 }
  0xee   :  { %v629_v21 = vpop.f32.mrb[1].mxu1  ;;  %679 = vmatprep.mubr.msk.f32.mxu0 %vm42_vm1, %v118_v20 }
  0xef   :  { %v278_v22 = vpop.f32.mrb[0].mxu0 }
  0xf0   :  { %v655_v24 = vpop.f32.mrb[1].mxu0 }
  0xf1   :  { %v123_v23 = vpop.f32.mrb[2].mxu1 }
  0xf2   :  { %v632_v25 = vpop.f32.mrb[3].mxu1  ;;  %680 = vmatmul.mubr.msk.f32.vlgmr.msra.gmra.mrb[6].mxu0 %vm42_vm1, %v123_v23 }
  0xf3   :  { %v283_v26 = vpop.f32.mrb[2].mxu0 }
  0xf4   :  { %v658_v28 = vpop.f32.mrb[3].mxu0 }
  0xf5   :  { %v128_v27 = vpop.f32.mrb[4].mxu1 }
  0xf6   :  { %v635_v29 = vpop.f32.mrb[5].mxu1  ;;  %682 = vmatprep.mubr.msk.f32.mxu0 %vm42_vm1, %v128_v27 }
  0xf7   :  { %v288_v30 = vpop.f32.mrb[4].mxu0 }
  0xf8   :  { %v661_v32 = vpop.f32.mrb[5].mxu0 }
  0xf9   :  { %v198_v31 = vpop.f32.mrb[6].mxu1 }
  0xfa   :  { %v642_v33 = vpop.f32.mrb[7].mxu1  ;;  %683 = vmatmul.mubr.msk.f32.gmra.mrb[8].mxu0 %vm42_vm1, %v198_v31 }
  0xfd   :  { %v203_v34 = vpop.f32.mrb[8].mxu1 }
  0xfe   :  { %v645_v35 = vpop.f32.mrb[9].mxu1  ;;  %685 = vmatprep.mubr.msk.f32.mxu0 %vm42_vm1, %v203_v34 }
 0x101   :  { %v208_v36 = vpop.f32.mrb[10].mxu1 }
 0x102   :  { %v648_v37 = vpop.f32.mrb[11].mxu1  ;;  %686 = vmatmul.mubr.msk.f32.gmra.mrb[10].mxu0 %vm42_vm1, %v208_v36 }
 0x103   :  { %688 = vmatprep.mubr.msk.f32.mxu0 %vm42_vm1, %v278_v22 }
 0x105   :  { %v358_v38 = vpop.f32.mrb[12].mxu1 }
 0x106   :  { %v668_v39 = vpop.f32.mrb[13].mxu1  ;;  %689 = vmatmul.mubr.msk.f32.gmra.mrb[12].mxu0 %vm42_vm1, %v283_v26 }
 0x107   :  { %691 = vmatprep.mubr.msk.f32.mxu0 %vm42_vm1, %v288_v30 }
 0x109   :  { %v363_v40 = vpop.f32.mrb[14].mxu1 }
 0x10a   :  { %v671_v41 = vpop.f32.mrb[15].mxu1  ;;  %692 = vmatmul.mubr.msk.f32.gmra.mrb[14].mxu0 %vm42_vm1, %v358_v38 }
 0x10b   :  { %694 = vmatprep.mubr.msk.f32.mxu0 %vm42_vm1, %v363_v40 }
 0x10d   :  { %v368_v42 = vpop.f32.mrb[16].mxu1 }
 0x10e   :  { %v674_v43 = vpop.f32.mrb[17].mxu1  ;;  %695 = vmatmul.mubr.msk.f32.gmra.mrb[16].mxu0 %vm42_vm1, %v368_v42 }
 0x1c5   :  { %v681_v44 = vpop.f32.mrb[6].mxu0 }
 0x1c6   :  { %534 = vst [vmem:[#allocation5 + $0x8] sm:$0xff] %v681_v44  ;;  %v474_v45 = vpop.f32.mrb[7].mxu0 }
 0x1c7   :  { %533 = vst [vmem:[#allocation5] sm:$0xff] %v474_v45 }
 0x1cd   :  { %v684_v46 = vpop.f32.mrb[8].mxu0 }
 0x1ce   :  { %537 = vst [vmem:[#allocation5 + $0x18] sm:$0xff] %v684_v46  ;;  %v484_v47 = vpop.f32.mrb[9].mxu0 }
 0x1cf   :  { %535 = vst [vmem:[#allocation5 + $0x10] sm:$0xff] %v484_v47 }
 0x1d5   :  { %v687_v48 = vpop.f32.mrb[10].mxu0 }
 0x1d6   :  { %539 = vst [vmem:[#allocation5 + $0x28] sm:$0xff] %v687_v48  ;;  %v494_v49 = vpop.f32.mrb[11].mxu0 }
 0x1d7   :  { %538 = vst [vmem:[#allocation5 + $0x20] sm:$0xff] %v494_v49 }
 0x1d9   :  { %v690_v50 = vpop.f32.mrb[12].mxu0 }
 0x1da   :  { %542 = vst [vmem:[#allocation5 + $0x38] sm:$0xff] %v690_v50  ;;  %v504_v51 = vpop.f32.mrb[13].mxu0 }
 0x1db   :  { %541 = vst [vmem:[#allocation5 + $0x30] sm:$0xff] %v504_v51 }
 0x1dd   :  { %v693_v52 = vpop.f32.mrb[14].mxu0 }
 0x1de   :  { %545 = vst [vmem:[#allocation5 + $0x48] sm:$0xff] %v693_v52  ;;  %v514_v53 = vpop.f32.mrb[15].mxu0 }
 0x1df   :  { %543 = vst [vmem:[#allocation5 + $0x40] sm:$0xff] %v514_v53 }
 0x1e1   :  { %v696_v54 = vpop.f32.mrb[16].mxu0 }
 0x1e2   :  { %547 = vst [vmem:[#allocation5 + $0x58] sm:$0xff] %v696_v54  ;;  %v524_v55 = vpop.f32.mrb[17].mxu0 }
 0x1e3   :  { %546 = vst [vmem:[#allocation5 + $0x50] sm:$0xff] %v524_v55 }
 0x1e4   :  { %753 = shalt.err (!%p750_p12)
}
 0x1e5   :  { %s754_s11 = scalar_lea.hbm %s879_s3, 1536 }
 0x1e6   :  { %p755_p13 = scmp.ne.s32.totalorder %s879_s3, %s754_s11  ;;  %p758_p0 = scmp.lt.u32.totalorder %s754_s11, %s879_s3 }
 0x1e8   :  { %p760_p1 = pnand %p758_p0, %p755_p13 }
 0x1ea   :  { %763 = shalt.err (!%p760_p1)
}
 0x1eb   :  { %559 = dma.vmem_to_hbm [thread:$0]  %s554_s7, 1536, %s879_s3, [#allocation4], %s769_s22, %s769_s22, %s770_s23  }
 0x1ec   :  { %766 = dma.done.wait [#allocation4], 1536  }
 0x1ed   :  { %767 = vsyncadd [#allocation4], 4294965760 }
 0x1ee   :  { %563 = vsyncpa [#allocation3], 1 }
 0x1ef   :  { %564 = vsyncpa [#allocation4], 1 }

</bundles_post_ra>
